<compile_context>
chip_gen: v6e
topology: v6e:2x2x1
jax: 0.10.0
libtpu: 0.0.40
codegen_flags: <defaults>
</compile_context>

<pallas_src>
import jax
import jax.numpy as jnp
from jax.experimental import pallas as pl
from jax.experimental.pallas import tpu as pltpu


def _h_sigmoid_kernel(x_ref, o_ref):
    x = x_ref[...]
    # relu6(x + 3) / 6 == clamp(x + 3, 0, 6) / 6
    o_ref[...] = (jnp.clip(x + 3.0, 0.0, 6.0) * (1.0 / 6.0)).astype(o_ref.dtype)


def h_sigmoid(x: jax.Array, *, block_bytes: int = 1 << 20) -> jax.Array:
    """Elementwise hard-sigmoid; semantics identical to the PyTorch module."""
    orig_shape = x.shape
    orig_dtype = x.dtype
    n = x.size
    if n == 0:
        return x

    itemsize = jnp.dtype(orig_dtype).itemsize
    # minimum sublane count per tile: 8 for 32-bit, 16 for 16-bit, 32 for 8-bit
    sublane = 8 * max(1, 4 // itemsize)

    flat = x.reshape(-1)

    # Pick the widest lane dimension (multiple of 128) that avoids any padding
    # copy: rows = n / lane_w must then be a multiple of `sublane`.
    lane_w = None
    for cand in (1024, 512, 256, 128):
        if n % (sublane * cand) == 0:
            lane_w = cand
            break

    padded = lane_w is None
    if padded:
        # Irregular size: pad only to the minimal (sublane, 128) granularity.
        # This is the only path that costs an extra HBM copy.
        lane_w = 128
        gran = sublane * lane_w
        n_pad = pl.cdiv(n, gran) * gran
        flat = jnp.pad(flat, (0, n_pad - n))
    else:
        n_pad = n

    rows = n_pad // lane_w                      # always a multiple of `sublane`
    slab = flat.reshape(rows, lane_w)           # lane-dense, zero-copy reshape

    # ~block_bytes per block, rounded down to a sublane multiple, clamped to rows.
    row_tile = max(sublane,
                   (block_bytes // (lane_w * itemsize)) // sublane * sublane)
    row_tile = min(row_tile, rows)
    grid = (pl.cdiv(rows, row_tile),)           # ragged last block handled by Pallas

    out = pl.pallas_call(
        _h_sigmoid_kernel,
        out_shape=jax.ShapeDtypeStruct((rows, lane_w), orig_dtype),
        grid_spec=pltpu.PrefetchScalarGridSpec(
            num_scalar_prefetch=0,
            grid=grid,
            in_specs=[pl.BlockSpec((row_tile, lane_w), lambda i: (i, 0))],
            out_specs=pl.BlockSpec((row_tile, lane_w), lambda i: (i, 0)),
        ),
        compiler_params=pltpu.CompilerParams(
            dimension_semantics=("parallel",)),
    )(slab)

    if padded:
        return out.reshape(-1)[:n].reshape(orig_shape)
    return out.reshape(orig_shape)


if __name__ == "__main__":
    key = jax.random.PRNGKey(0)
    # NCHW input consistent with typical use of h_sigmoid inside a conv net
    x = jax.random.normal(key, (2, 4, 16, 16), dtype=jnp.float32) * 4.0

    y = jax.block_until_ready(h_sigmoid(x))

    # correctness check against pure-JAX reference of the PyTorch forward
    y_ref = jnp.clip(x + 3.0, 0.0, 6.0) / 6.0
    assert y.shape == x.shape and y.dtype == x.dtype
    assert jnp.allclose(y, y_ref, atol=1e-6), "mismatch vs reference"

    print("KERNEL_OK")
</pallas_src>

<mosaic_0001>
module attributes {stable_mosaic.version = 11 : i64} {
  func.func @_h_sigmoid_kernel(%arg0: i32, %arg1: memref<8x256xf32, #tpu.memory_space<vmem>>, %arg2: memref<8x256xf32, #tpu.memory_space<vmem>>) attributes {dimension_semantics = [#tpu.dimension_semantics<parallel>], iteration_bounds = array<i64: 1>, scalar_prefetch = 0 : i64, scratch_operands = 0 : i64, tpu.core_type = #tpu.core_type<tc>, window_params = [{transform_indices = @transform_0, window_bounds = array<i64: 8, 256>}, {transform_indices = @transform_1, window_bounds = array<i64: 8, 256>}]} {
    %c0 = arith.constant 0 : index
    %c0_0 = arith.constant 0 : index
    %0 = vector.load %arg1[%c0, %c0_0] : memref<8x256xf32, #tpu.memory_space<vmem>>, vector<8x256xf32>
    %cst = arith.constant 3.000000e+00 : f32
    %1 = vector.broadcast %cst : f32 to vector<8x256xf32>
    %2 = arith.addf %0, %1 : vector<8x256xf32>
    %cst_1 = arith.constant 0.000000e+00 : f32
    %cst_2 = arith.constant 6.000000e+00 : f32
    %3 = vector.broadcast %cst_1 : f32 to vector<8x256xf32>
    %4 = arith.maximumf %3, %2 : vector<8x256xf32>
    %5 = vector.broadcast %cst_2 : f32 to vector<8x256xf32>
    %6 = arith.minimumf %5, %4 : vector<8x256xf32>
    %cst_3 = arith.constant 0.166666672 : f32
    %7 = vector.broadcast %cst_3 : f32 to vector<8x256xf32>
    %8 = arith.mulf %6, %7 : vector<8x256xf32>
    %c0_4 = arith.constant 0 : index
    %c0_5 = arith.constant 0 : index
    %9 = vector.load %arg2[%c0_4, %c0_5] : memref<8x256xf32, #tpu.memory_space<vmem>>, vector<8x256xf32>
    tpu.vector_store %arg2[%c0_4, %c0_5], %8 {strides = array<i32>} : memref<8x256xf32, #tpu.memory_space<vmem>>, vector<8x256xf32>,
    return
  }
  func.func @transform_0(%arg0: i32) -> (i32, i32) {
    %c0_i32 = arith.constant 0 : i32
    %c0_i32_0 = arith.constant 0 : i32
    return %arg0, %c0_i32 : i32, i32
  }
  func.func @transform_1(%arg0: i32) -> (i32, i32) {
    %c0_i32 = arith.constant 0 : i32
    %c0_i32_0 = arith.constant 0 : i32
    return %arg0, %c0_i32 : i32, i32
  }
}

</mosaic_0001>

<bundles_post_ra>
// kernel: tpu_custom_call.1
= control target key start
LH: loop header
LB: loop body
LE: loop exit
PB: predicated region body
PF: predicated region fallthrough
CT: control target
= control target key end

     0   :  { %6 = vsyncpa [#allocation3], 0  ;;  %s112_s0 = inlined_call_operand.hbm [shape: f32[8,256], index: 0, kind: input, shape index: {}]   ;;  %s113_s1 = inlined_call_operand.hbm [shape: f32[8,256], index: 1, kind: output, shape index: {}]  }
   0x1   :  { %7 = vsyncpa [#allocation4], 0  ;;  %s94_s6 = smov [#allocation2]  }
   0x2   :  { %s14_s7 = sshll.u32 %s94_s6, 4  ;;  %s15_s7 = int_to_ptr.vmem [resolvable:$true] %s14_s7 }
   0x3   :  { %s58_s8 = scalar_lea.vmem %s15_s7, 256  ;;  %p63_p1 = scmp.lt.s32.totalorder %s15_s7, %s15_s7 }
   0x4   :  { %p59_p0 = scmp.ne.s32.totalorder %s15_s7, %s58_s8  ;;  %p64_p2 = scmp.lt.s32.totalorder %s58_s8, %s58_s8 }
   0x6   :  { %p65_p3 = por %p64_p2, %p63_p1 }
   0x8   :  { %p66_p4 = pnand %p65_p3, %p59_p0 }
   0xa   :  { %69 = shalt.err (!%p66_p4)
}
   0xb   :  { %17 = dma.hbm_to_vmem [thread:$0]  %s112_s0, 256, %s15_s7, [#allocation3]  }
   0xc   :  { %90 = dma.done.wait [#allocation3], 256  }
   0xd   :  { %91 = vsyncadd [#allocation3], 4294967040  ;;  %v21_v0 = vld [vmem:[#allocation2] sm:$0xff]  ;;  %v22_v1 = vld [vmem:[#allocation2 + $0x8] sm:$0xff]  ;;  %s95_s11 = smov [#allocation5]  }
   0xe   :  { %v23_v2 = vadd.f32 3.0, %v21_v0  ;;  %v24_v3 = vadd.f32 3.0, %v22_v1  ;;  %s39_s12 = sshll.u32 %s95_s11, 4  ;;  %s40_s12 = int_to_ptr.vmem [resolvable:$true] %s39_s12 }
   0xf   :  { %s70_s13 = scalar_lea.vmem %s40_s12, 256  ;;  %p75_p6 = scmp.lt.s32.totalorder %s40_s12, %s40_s12 }
  0x10   :  { %v25_v4 = vmax.f32 %v23_v2, 0.0  ;;  %v26_v5 = vmax.f32 %v24_v3, 0.0  ;;  %p71_p5 = scmp.ne.s32.totalorder %s40_s12, %s70_s13  ;;  %p76_p7 = scmp.lt.s32.totalorder %s70_s13, %s70_s13 }
  0x12   :  { %v27_v6 = vmin.f32 %v25_v4, 6.0  ;;  %v28_v7 = vmin.f32 %v26_v5, 6.0  ;;  %p77_p8 = por %p76_p7, %p75_p6 }
  0x14   :  { %v29_v8 = vmul.f32 0.16666667, %v27_v6  ;;  %v30_v9 = vmul.f32 0.16666667, %v28_v7  ;;  %p78_p9 = pnand %p77_p8, %p71_p5 }
  0x16   :  { %31 = vst [vmem:[#allocation5] sm:$0xff] %v29_v8  ;;  %32 = vst [vmem:[#allocation5 + $0x8] sm:$0xff] %v30_v9 }
  0x17   :  { %81 = shalt.err (!%p78_p9)
}
  0x18   :  { %42 = dma.vmem_to_hbm [thread:$0]  %s40_s12, 256, %s113_s1, [#allocation4]  }
  0x19   :  { %92 = dma.done.wait [#allocation4], 256  }
  0x1a   :  { %93 = vsyncadd [#allocation4], 4294967040 }
  0x1b   :  { %46 = vsyncpa [#allocation3], 1 }
  0x1c   :  { %47 = vsyncpa [#allocation4], 1 }

</bundles_post_ra>
